<compile_context>
chip_gen: v7x
topology: tpu7x:2x2x1
jax: 0.10.0
libtpu: 0.0.40
codegen_flags: <defaults>
</compile_context>

<pallas_src>
import functools

import jax
import jax.numpy as jnp
from jax.experimental import pallas as pl
from jax.experimental.pallas import tpu as pltpu


def _round_up(x, m):
    return (x + m - 1) // m * m


def _gcn_kernel(*refs, has_bias):
    if has_bias:
        adj_ref, x_ref, w_ref, b_ref, out_ref, support_ref = refs
    else:
        adj_ref, x_ref, w_ref, out_ref, support_ref = refs
        b_ref = None

    # support = X @ W, computed once per batch (the node-tile axis is the
    # innermost grid axis, so program_id(1) == 0 marks the first tile of each
    # batch).  The scratch persists across grid steps.
    @pl.when(pl.program_id(1) == 0)
    def _():
        support_ref[...] = jnp.dot(
            x_ref[...], w_ref[...], preferred_element_type=jnp.float32)

    # output row-tile = A[tile, :] @ support   (MXU, f32 accumulation)
    out = jnp.dot(adj_ref[...], support_ref[...],
                  preferred_element_type=jnp.float32)
    if b_ref is not None:
        out = out + b_ref[...]
    out_ref[...] = out.astype(out_ref.dtype)


def graph_convolution(x, adj_all, weight, bias=None, *, tile_n=256):
    """GraphConvolution forward.

    x       : (B, N, in_features) or (N, in_features)
    adj_all : (N, N) adjacency, shared across the batch (broadcast matmul)
    weight  : (in_features, out_features)
    bias    : optional, any shape reshapeable to (out_features,)
    """
    squeeze_batch = (x.ndim == 2)
    if squeeze_batch:
        x = x[None]
    B, N, Fin = x.shape
    Fout = weight.shape[1]
    assert adj_all.shape == (N, N), "adj_all must be (N, N)"
    assert weight.shape[0] == Fin, "weight must be (in_features, out_features)"

    # Row-tile of the output / adjacency.  Multiple of 8 (sublane), capped at N.
    tn = min(tile_n, _round_up(N, 8))
    tn = _round_up(tn, 8)
    n_pad = _round_up(N, tn)
    if n_pad != N:
        x = jnp.pad(x, ((0, 0), (0, n_pad - N), (0, 0)))
        adj_all = jnp.pad(adj_all, ((0, n_pad - N), (0, n_pad - N)))

    grid = (B, n_pad // tn)

    in_specs = [
        # adjacency row tile, streams over the node-tile axis
        pl.BlockSpec((tn, n_pad), lambda b, i: (i, 0)),
        # full per-batch node features (resident across node tiles)
        pl.BlockSpec((None, n_pad, Fin), lambda b, i: (b, 0, 0)),
        # shared weight, resident
        pl.BlockSpec((Fin, Fout), lambda b, i: (0, 0)),
    ]
    args = [adj_all, x, weight]

    has_bias = bias is not None
    if has_bias:
        args.append(jnp.reshape(bias, (1, Fout)).astype(jnp.float32))
        in_specs.append(pl.BlockSpec((1, Fout), lambda b, i: (0, 0)))

    out = pl.pallas_call(
        functools.partial(_gcn_kernel, has_bias=has_bias),
        out_shape=jax.ShapeDtypeStruct((B, n_pad, Fout), x.dtype),
        grid_spec=pltpu.PrefetchScalarGridSpec(
            num_scalar_prefetch=0,
            grid=grid,
            in_specs=in_specs,
            out_specs=pl.BlockSpec((None, tn, Fout), lambda b, i: (b, i, 0)),
            scratch_shapes=[pltpu.VMEM((n_pad, Fout), jnp.float32)],
        ),
        compiler_params=pltpu.CompilerParams(
            dimension_semantics=("parallel", "arbitrary")),
    )(*args)

    out = out[:, :N, :]
    if squeeze_batch:
        out = out[0]
    return out


def graph_convolution_ref(x, adj_all, weight, bias=None):
    """Pure-JAX reference mirroring the PyTorch forward."""
    support = x @ weight                              # (B, N, Fout)
    out = jnp.einsum("ij,bjf->bif", adj_all, support)  # adj broadcast over batch
    if bias is not None:
        out = out + jnp.reshape(bias, (1, 1, -1))
    return out


if __name__ == "__main__":
    B, N, Fin, Fout = 2, 72, 32, 32   # N=72 exercises padding to the 32-row tile

    key = jax.random.PRNGKey(0)
    kx, ka, kw, kb = jax.random.split(key, 4)

    x = jax.random.normal(kx, (B, N, Fin), jnp.float32)

    # row-normalized symmetric adjacency
    a = jax.random.uniform(ka, (N, N), jnp.float32)
    adj = 0.5 * (a + a.T)
    adj = adj / jnp.sum(adj, axis=-1, keepdims=True)

    # nn.Parameter init: uniform(-stdv, stdv), stdv = 1/sqrt(out_features)
    stdv = 1.0 / jnp.sqrt(jnp.float32(Fout))
    weight = jax.random.uniform(kw, (Fin, Fout), jnp.float32, -stdv, stdv)
    bias = jax.random.uniform(kb, (1, 1, Fout), jnp.float32, -stdv, stdv)

    # bias=False path (module default)
    out = jax.block_until_ready(graph_convolution(x, adj, weight, tile_n=32))
    ref = graph_convolution_ref(x, adj, weight)
    assert out.shape == (B, N, Fout)
    assert jnp.allclose(out, ref, atol=1e-5, rtol=1e-5)

    # bias=True path
    out_b = jax.block_until_ready(
        graph_convolution(x, adj, weight, bias, tile_n=32))
    ref_b = graph_convolution_ref(x, adj, weight, bias)
    assert jnp.allclose(out_b, ref_b, atol=1e-5, rtol=1e-5)

    print("KERNEL_OK")
</pallas_src>

<mosaic_0001>
module attributes {stable_mosaic.version = 11 : i64} {
  func.func @_gcn_kernel(%arg0: i32, %arg1: i32, %arg2: memref<32x96xf32, #tpu.memory_space<vmem>>, %arg3: memref<1x96x32xf32, #tpu.memory_space<vmem>>, %arg4: memref<32x32xf32, #tpu.memory_space<vmem>>, %arg5: memref<1x32x32xf32, #tpu.memory_space<vmem>>, %arg6: memref<96x32xf32, #tpu.memory_space<vmem>>) attributes {dimension_semantics = [#tpu.dimension_semantics<parallel>, #tpu.dimension_semantics<arbitrary>], iteration_bounds = array<i64: 2, 3>, scalar_prefetch = 0 : i64, scratch_operands = 1 : i64, tpu.core_type = #tpu.core_type<tc>, window_params = [{transform_indices = @transform_0, window_bounds = array<i64: 32, 96>}, {transform_indices = @transform_1, window_bounds = array<i64: 1, 96, 32>}, {pipeline_mode = #tpu.pipeline_mode<synchronous>, transform_indices = @transform_2, window_bounds = array<i64: 32, 32>}, {transform_indices = @transform_3, window_bounds = array<i64: 1, 32, 32>}]} {
    %c0_i32 = arith.constant 0 : i32
    %0 = arith.cmpi eq, %arg1, %c0_i32 : i32
    %1 = arith.extui %0 : i1 to i32
    %c0_i32_0 = arith.constant 0 : i32
    %2 = arith.cmpi ne, %1, %c0_i32_0 : i32
    scf.if %2 {
      %c0_7 = arith.constant 0 : index
      %c0_8 = arith.constant 0 : index
      %c0_9 = arith.constant 0 : index
      %9 = vector.load %arg3[%c0_7, %c0_8, %c0_9] : memref<1x96x32xf32, #tpu.memory_space<vmem>>, vector<1x96x32xf32>
      %10 = vector.shape_cast %9 : vector<1x96x32xf32> to vector<96x32xf32>
      %c0_10 = arith.constant 0 : index
      %c0_11 = arith.constant 0 : index
      %11 = vector.load %arg4[%c0_10, %c0_11] : memref<32x32xf32, #tpu.memory_space<vmem>>, vector<32x32xf32>
      %cst_12 = arith.constant dense<0.000000e+00> : vector<96x32xf32>
      %12 = tpu.matmul %10, %11, %cst_12 {dimension_numbers = #tpu.dot_dimension_numbers<[1], [0], [0], [1], [0, 0, 1, 1], [], []>} : vector<96x32xf32>, vector<32x32xf32>, vector<96x32xf32> -> vector<96x32xf32>
      %c0_13 = arith.constant 0 : index
      %c0_14 = arith.constant 0 : index
      %13 = vector.load %arg6[%c0_13, %c0_14] : memref<96x32xf32, #tpu.memory_space<vmem>>, vector<96x32xf32>
      tpu.vector_store %arg6[%c0_13, %c0_14], %12 {strides = array<i32>} : memref<96x32xf32, #tpu.memory_space<vmem>>, vector<96x32xf32>,
    } else {
    }
    %c0 = arith.constant 0 : index
    %c0_1 = arith.constant 0 : index
    %3 = vector.load %arg2[%c0, %c0_1] : memref<32x96xf32, #tpu.memory_space<vmem>>, vector<32x96xf32>
    %c0_2 = arith.constant 0 : index
    %c0_3 = arith.constant 0 : index
    %4 = vector.load %arg6[%c0_2, %c0_3] : memref<96x32xf32, #tpu.memory_space<vmem>>, vector<96x32xf32>
    %cst = arith.constant dense<0.000000e+00> : vector<32x32xf32>
    %5 = tpu.matmul %3, %4, %cst {dimension_numbers = #tpu.dot_dimension_numbers<[1], [0], [0], [1], [0, 0, 1, 1], [], []>} : vector<32x96xf32>, vector<96x32xf32>, vector<32x32xf32> -> vector<32x32xf32>
    %c0_4 = arith.constant 0 : index
    %c0_5 = arith.constant 0 : index
    %c0_6 = arith.constant 0 : index
    %6 = vector.load %arg5[%c0_4, %c0_5, %c0_6] : memref<1x32x32xf32, #tpu.memory_space<vmem>>, vector<1x32x32xf32>
    %7 = vector.shape_cast %6 : vector<1x32x32xf32> to vector<32x32xf32>
    %8 = vector.shape_cast %5 : vector<32x32xf32> to vector<1x32x32xf32>
    tpu.vector_store %arg5[%c0_4, %c0_5, %c0_6], %8 {strides = array<i32>} : memref<1x32x32xf32, #tpu.memory_space<vmem>>, vector<1x32x32xf32>,
    return
  }
  func.func @transform_0(%arg0: i32, %arg1: i32) -> (i32, i32) {
    %c0_i32 = arith.constant 0 : i32
    %c0_i32_0 = arith.constant 0 : i32
    return %arg1, %c0_i32 : i32, i32
  }
  func.func @transform_1(%arg0: i32, %arg1: i32) -> (i32, i32, i32) {
    %c0_i32 = arith.constant 0 : i32
    %c0_i32_0 = arith.constant 0 : i32
    %c0_i32_1 = arith.constant 0 : i32
    return %arg0, %c0_i32, %c0_i32_0 : i32, i32, i32
  }
  func.func @transform_2(%arg0: i32, %arg1: i32) -> (i32, i32) {
    %c0_i32 = arith.constant 0 : i32
    %c0_i32_0 = arith.constant 0 : i32
    %c0_i32_1 = arith.constant 0 : i32
    return %c0_i32, %c0_i32_0 : i32, i32
  }
  func.func @transform_3(%arg0: i32, %arg1: i32) -> (i32, i32, i32) {
    %c0_i32 = arith.constant 0 : i32
    %c0_i32_0 = arith.constant 0 : i32
    return %arg0, %arg1, %c0_i32 : i32, i32, i32
  }
}

</mosaic_0001>

<bundles_post_ra>
// kernel: tpu_custom_call.1
= control target key start
LH: loop header
LB: loop body
LE: loop exit
PB: predicated region body
PF: predicated region fallthrough
CT: control target
= control target key end

     0   :  { %s892_s12 = smov 0   ;;  %s894_s13 = smov 0   ;;  %s1016_s0 = inlined_call_operand.vmem [shape: f32[96,96], index: 0, kind: input, shape index: {}]   ;;  %s1017_s1 = inlined_call_operand.vmem [shape: f32[2,96,32], index: 1, kind: input, shape index: {}]   ;;  %s1018_s2 = inlined_call_operand.vmem [shape: f32[32,32], index: 2, kind: input, shape index: {}]   ;;  %s1019_s3 = inlined_call_operand.vmem [shape: f32[2,96,32], index: 3, kind: output, shape index: {}]  }
   0x1   :  { %s896_s14 = smov 0   ;;  %s898_s15 = smov 0  }
   0x2   :  { %s900_s16 = smov 0  }
   0x3 LB: > { %s22_s17 = sadd.s32 1, %s862_s14  ;;  %s25_s18 = sadd.s32 1, %s866_s15  ;;  %s870_s16 = sphi %s900_s16, %s13_s16   ;;  %s866_s15 = sphi %s898_s15, %s1023_s15   ;;  %s862_s14 = sphi %s896_s14, %s1022_s14   ;;  %s858_s13 = sphi %s894_s13, %s1021_s13   ;;  %s854_s12 = sphi %s892_s12, %s1020_s12  }
   0x4   : > { %p23_p0 = scmp.ge.s32.totalorder %s22_s17, 3  ;;  %p629_p1 = scmp.ge.s32.totalorder %s870_s16, 1 }
   0x5   : > { %p162_p2 = scmp.lt.s32.totalorder %s870_s16, 7 }
   0x6   : > { %s1025_s17 = smov (%p23_p0, %s22_s17), 0  ;;  %s1027_s18 = smov (!%p23_p0, %s25_s18), %s866_s15 }
   0x7   : > { %p163_p3 = pnand %p629_p1, %p162_p2  ;;  %p27_p4 = scmp.ge.s32.totalorder %s1027_s18, 2 }
   0x8   : > { %s630_s19 = sshll.u32 (!%p163_p3), %s854_s12, 2  ;;  %p201_p5 = scmp.lt.s32.totalorder (!%p163_p3), %s858_s13, 1 }
   0x9   : > { %s1029_s18 = smov (%p27_p4, %s1027_s18), 0  ;;  %166 = sbr.rel (%p163_p3) target bundleno = 492 (0x1ec), region = 32 }
   0xa   : > { %p196_p6 = scmp.lt.s32.totalorder (!%p163_p3), %s630_s19, 11  ;;  %p635_p7 = scmp.ne.s32.totalorder (!%p163_p3), %s854_s12, 0 }
  0x10   : > { %s1031_s13 = smov (!%p201_p5, %s858_s13), 1  ;;  %s1033_s19 = smov (!%p196_p6, %s630_s19), 11 }
  0x11   : > { %s790_s20 = smul.u32 96, %s1031_s13  ;;  %s631_s21 = sshll.u32 %s1033_s19, 3  ;;  %v232_v0 = vld [vmem:[%s1018_s2] sm:$0xff] (!%p635_p7)  ;;  %v233_v1 = vld [vmem:[%s1018_s2 + $0x8] sm:$0xff] (!%p635_p7)  ;;  %v234_v2 = vld [vmem:[%s1018_s2 + $0x10] sm:$0xff] (!%p635_p7)  ;;  %vm236_vm0 = vcmask (!%p635_p7), 261120  }
  0x12   : > { %s791_s22 = smul.u32 12, %s1031_s13  ;;  %s928_s25 = scalar_lea.vmem %s1016_s0, %s631_s21  ;;  %v742_v3 = vpack.c.bf16 (!%p635_p7), %v233_v1, %v232_v0  ;;  %v235_v4 = vld [vmem:[%s1018_s2 + $0x18] sm:$0xff] (!%p635_p7) }
  0x13   : > { %s933_s28 = scalar_lea.vmem %s1017_s1, %s790_s20  ;;  %219 = sbr.rel (%p635_p7) target bundleno = 251 (0xfb), region = 36  ;;  %v746_v7 = vpack.c.bf16 (!%p635_p7), %v235_v4, %v234_v2 }
  0x14   : > { %s212_s29 = sadd.s32 %s791_s22, %s1033_s19  ;;  %v220_v5 = vld [vmem:[%s933_s28] sm:$0xff] (!%p635_p7)  ;;  %v226_v6 = vld [vmem:[%s933_s28 + $0x30] sm:$0xff] (!%p635_p7)  ;;  %743 = vmatprep.subr.bf16.mxu0 (!%p635_p7), %v742_v3  ;;  %774 = vmatprep.subr.bf16.mxu1 (!%p635_p7), %v742_v3  ;;  %v221_v8 = vld [vmem:[%s933_s28 + $0x8] sm:$0xff] (!%p635_p7) }
  0x15   : > { %s634_s30 = sshll.u32 %s212_s29, 3  ;;  %694 = vmatprep.mubr.msk.f32.mxu0 (!%p635_p7), %vm236_vm0, %v220_v5  ;;  %703 = vmatprep.mubr.msk.f32.mxu1 (!%p635_p7), %vm236_vm0, %v226_v6  ;;  %v227_v9 = vld [vmem:[%s933_s28 + $0x38] sm:$0xff] (!%p635_p7)  ;;  %v222_v10 = vld [vmem:[%s933_s28 + $0x10] sm:$0xff] (!%p635_p7)  ;;  %v228_v11 = vld [vmem:[%s933_s28 + $0x40] sm:$0xff] (!%p635_p7) }
  0x16   : > { %s938_s6 = scalar_lea.vmem %s1019_s3, %s634_s30  ;;  %745 = vmatpush3.bf16.msra.mxu0 (!%p635_p7), %v742_v3  ;;  %776 = vmatpush3.bf16.msra.mxu1 (!%p635_p7), %v742_v3  ;;  %v223_v12 = vld [vmem:[%s933_s28 + $0x18] sm:$0xff] (!%p635_p7)  ;;  %v229_v13 = vld [vmem:[%s933_s28 + $0x48] sm:$0xff] (!%p635_p7)  ;;  %v224_v14 = vld [vmem:[%s933_s28 + $0x20] sm:$0xff] (!%p635_p7) }
  0x17   : > { %747 = vmatprep.subr.bf16.mxu0 (!%p635_p7), %v746_v7  ;;  %775 = vmatprep.subr.bf16.mxu1 (!%p635_p7), %v746_v7  ;;  %v230_v15 = vld [vmem:[%s933_s28 + $0x50] sm:$0xff] (!%p635_p7)  ;;  %v225_v16 = vld [vmem:[%s933_s28 + $0x28] sm:$0xff] (!%p635_p7)  ;;  %v231_v17 = vld [vmem:[%s933_s28 + $0x58] sm:$0xff] (!%p635_p7) }
  0x1a   : > { %749 = vmatpush3.bf16.msra.mxu0 %v746_v7  ;;  %777 = vmatpush3.bf16.msra.mxu1 %v746_v7 }
  0x1d   : > { %695 = vmatmul.mubr.msk.f32.vlgmr.msra.gmra.mrb[0].mxu0 %vm236_vm0, %v221_v8  ;;  %704 = vmatmul.mubr.msk.f32.vlgmr.msra.gmra.mrb[0].mxu1 %vm236_vm0, %v227_v9 }
  0x1e   : > { %697 = vmatprep.mubr.msk.f32.mxu0 %vm236_vm0, %v222_v10  ;;  %706 = vmatprep.mubr.msk.f32.mxu1 %vm236_vm0, %v228_v11 }
  0x21   : > { %698 = vmatmul.mubr.msk.f32.gmra.mrb[2].mxu0 %vm236_vm0, %v223_v12  ;;  %707 = vmatmul.mubr.msk.f32.gmra.mrb[2].mxu1 %vm236_vm0, %v229_v13 }
  0x22   : > { %700 = vmatprep.mubr.msk.f32.mxu0 %vm236_vm0, %v224_v14  ;;  %709 = vmatprep.mubr.msk.f32.mxu1 %vm236_vm0, %v230_v15 }
  0x25   : > { %701 = vmatmul.mubr.msk.f32.gmra.mrb[4].mxu0 %vm236_vm0, %v225_v16  ;;  %710 = vmatmul.mubr.msk.f32.gmra.mrb[4].mxu1 %vm236_vm0, %v231_v17 }
  0xf0   : > { %v696_v18 = vpop.f32.mrb[0].mxu0  ;;  %v705_v19 = vpop.f32.mrb[0].mxu1 }
  0xf1   : > { %399 = vst.msk [vmem:[#allocation2 + $0x8] sm:$0xff] %vm236_vm0, %v696_v18  ;;  %405 = vst.msk [vmem:[#allocation2 + $0x38] sm:$0xff] %vm236_vm0, %v705_v19  ;;  %v339_v20 = vpop.f32.mrb[1].mxu0  ;;  %v369_v21 = vpop.f32.mrb[1].mxu1 }
  0xf2   : > { %398 = vst.msk [vmem:[#allocation2] sm:$0xff] %vm236_vm0, %v339_v20  ;;  %404 = vst.msk [vmem:[#allocation2 + $0x30] sm:$0xff] %vm236_vm0, %v369_v21 }
  0xf4   : > { %v699_v22 = vpop.f32.mrb[2].mxu0  ;;  %v708_v23 = vpop.f32.mrb[2].mxu1 }
  0xf5   : > { %401 = vst.msk [vmem:[#allocation2 + $0x18] sm:$0xff] %vm236_vm0, %v699_v22  ;;  %407 = vst.msk [vmem:[#allocation2 + $0x48] sm:$0xff] %vm236_vm0, %v708_v23  ;;  %v349_v24 = vpop.f32.mrb[3].mxu0  ;;  %v379_v25 = vpop.f32.mrb[3].mxu1 }
  0xf6   : > { %400 = vst.msk [vmem:[#allocation2 + $0x10] sm:$0xff] %vm236_vm0, %v349_v24  ;;  %406 = vst.msk [vmem:[#allocation2 + $0x40] sm:$0xff] %vm236_vm0, %v379_v25 }
  0xf8   : > { %v702_v26 = vpop.f32.mrb[4].mxu0  ;;  %v711_v27 = vpop.f32.mrb[4].mxu1 }
  0xf9   : > { %403 = vst.msk [vmem:[#allocation2 + $0x28] sm:$0xff] %vm236_vm0, %v702_v26  ;;  %409 = vst.msk [vmem:[#allocation2 + $0x58] sm:$0xff] %vm236_vm0, %v711_v27  ;;  %v359_v28 = vpop.f32.mrb[5].mxu0  ;;  %v389_v29 = vpop.f32.mrb[5].mxu1 }
  0xfa   : > { %402 = vst.msk [vmem:[#allocation2 + $0x20] sm:$0xff] %vm236_vm0, %v359_v28  ;;  %408 = vst.msk [vmem:[#allocation2 + $0x50] sm:$0xff] %vm236_vm0, %v389_v29 }
  0xfb PF: > { %v414_v30 = vld [vmem:[#allocation2] sm:$0xff]  ;;  %v415_v31 = vld [vmem:[#allocation2 + $0x8] sm:$0xff]  ;;  %vm426_vm1 = vcmask 785408   ;;  %v412_v39 = vld [vmem:[%s928_s25 + $0x10] sm:$0xff]  ;;  %vm524_vm2 = vcmask 261120  }
  0xfc   : > { %v750_v33 = vpack.c.bf16 %v415_v31, %v414_v30  ;;  %v417_v34 = vld [vmem:[#allocation2 + $0x18] sm:$0xff]  ;;  %v410_v38 = vld [vmem:[%s928_s25] sm:$0xff]  ;;  %v420_v41 = vld [vmem:[#allocation2 + $0x30] sm:$0xff]  ;;  %739 = vmatprep.mubr.msk.f32.mxu1 %vm426_vm1, %v412_v39 }
  0xfd   : > { %v416_v32 = vld [vmem:[#allocation2 + $0x10] sm:$0xff]  ;;  %v421_v42 = vld [vmem:[#allocation2 + $0x38] sm:$0xff]  ;;  %736 = vmatprep.mubr.msk.f32.mxu0 %vm426_vm1, %v410_v38  ;;  %v422_v44 = vld [vmem:[#allocation2 + $0x40] sm:$0xff] }
  0xfe   : > { %v754_v35 = vpack.c.bf16 %v417_v34, %v416_v32  ;;  %751 = vmatprep.subr.bf16.mxu0 %v750_v33  ;;  %778 = vmatprep.subr.bf16.mxu1 %v750_v33  ;;  %v762_v43 = vpack.c.bf16 %v421_v42, %v420_v41  ;;  %v423_v45 = vld [vmem:[#allocation2 + $0x48] sm:$0xff]  ;;  %v413_v51 = vld [vmem:[%s928_s25 + $0x18] sm:$0xff] }
  0xff   : > { %753 = vmatpush3.bf16.msra.mxu0 %v750_v33  ;;  %784 = vmatpush3.bf16.msra.mxu1 %v750_v33  ;;  %v766_v46 = vpack.c.bf16 %v423_v45, %v422_v44  ;;  %v411_v50 = vld [vmem:[%s928_s25 + $0x8] sm:$0xff] }
 0x100   : > { %v419_v37 = vld [vmem:[#allocation2 + $0x28] sm:$0xff]  ;;  %755 = vmatprep.subr.bf16.mxu0 %v754_v35  ;;  %779 = vmatprep.subr.bf16.mxu1 %v754_v35  ;;  %v425_v48 = vld [vmem:[#allocation2 + $0x58] sm:$0xff] }
 0x101   : > { %v418_v36 = vld [vmem:[#allocation2 + $0x20] sm:$0xff]  ;;  %v424_v47 = vld [vmem:[#allocation2 + $0x50] sm:$0xff] }
 0x102   : > { %v758_v40 = vpack.c.bf16 %v419_v37, %v418_v36  ;;  %v770_v49 = vpack.c.bf16 %v425_v48, %v424_v47 }
 0x103   : > { %757 = vmatpush3.bf16.msra.mxu0 %v754_v35  ;;  %785 = vmatpush3.bf16.msra.mxu1 %v754_v35 }
 0x104   : > { %759 = vmatprep.subr.bf16.mxu0 %v758_v40  ;;  %780 = vmatprep.subr.bf16.mxu1 %v758_v40 }
 0x107   : > { %761 = vmatpush3.bf16.msra.mxu0 %v758_v40  ;;  %786 = vmatpush3.bf16.msra.mxu1 %v758_v40 }
 0x108   : > { %763 = vmatprep.subr.bf16.mxu0 %v762_v43  ;;  %781 = vmatprep.subr.bf16.mxu1 %v762_v43 }
 0x10b   : > { %765 = vmatpush3.bf16.msra.mxu0 %v762_v43  ;;  %787 = vmatpush3.bf16.msra.mxu1 %v762_v43 }
 0x10c   : > { %767 = vmatprep.subr.bf16.mxu0 %v766_v46  ;;  %782 = vmatprep.subr.bf16.mxu1 %v766_v46 }
 0x10f   : > { %769 = vmatpush3.bf16.msra.mxu0 %v766_v46  ;;  %788 = vmatpush3.bf16.msra.mxu1 %v766_v46 }
 0x110   : > { %771 = vmatprep.subr.bf16.mxu0 %v770_v49  ;;  %783 = vmatprep.subr.bf16.mxu1 %v770_v49 }
 0x113   : > { %773 = vmatpush3.bf16.msra.mxu0 %v770_v49  ;;  %789 = vmatpush3.bf16.msra.mxu1 %v770_v49 }
 0x116   : > { %737 = vmatmul.mubr.msk.f32.vlgmr.msra.gmra.mrb[0].mxu0 %vm426_vm1, %v411_v50  ;;  %740 = vmatmul.mubr.msk.f32.vlgmr.msra.gmra.mrb[0].mxu1 %vm426_vm1, %v413_v51 }
 0x1e9   : > { %v738_v52 = vpop.f32.mrb[0].mxu0  ;;  %v741_v53 = vpop.f32.mrb[0].mxu1 }
 0x1ea   : > { %526 = vst.msk [vmem:[%s938_s6 + $0x8] sm:$0xff] %vm524_vm2, %v738_v52  ;;  %528 = vst.msk [vmem:[%s938_s6 + $0x18] sm:$0xff] %vm524_vm2, %v741_v53  ;;  %v505_v54 = vpop.f32.mrb[1].mxu0  ;;  %v515_v55 = vpop.f32.mrb[1].mxu1 }
 0x1eb   : > { %525 = vst.msk [vmem:[%s938_s6] sm:$0xff] %vm524_vm2, %v505_v54  ;;  %527 = vst.msk [vmem:[%s938_s6 + $0x10] sm:$0xff] %vm524_vm2, %v515_v55 }
 0x1ec PF: > { %s13_s16 = sadd.s32 1, %s870_s16   ;;  %s1020_s12 = smov %s862_s14 }
 0x1ed   : > { %p10_p8 = scmp.ge.s32.totalorder %s13_s16, 8   ;;  %s1021_s13 = smov %s866_s15 }
 0x1ee   : > { %s1022_s14 = smov %s1025_s17  ;;  %s1023_s15 = smov %s1029_s18 }
 0x1ef   :  { %12 = sbr.rel (!%p10_p8) target bundleno = 3 (0x3), region = 69 }

</bundles_post_ra>
